<compile_context>
chip_gen: v7x
topology: tpu7x:2x2x1
jax: 0.10.0
libtpu: 0.0.40
codegen_flags: <defaults>
</compile_context>

<pallas_src>
import functools

import jax
import jax.numpy as jnp
from jax.experimental import pallas as pl
from jax.experimental.pallas import tpu as pltpu


def _round_up(n, m):
    return ((n + m - 1) // m) * m


def _monotone_poly_kernel(xT_ref, coefT_ref, intercept_ref, outT_ref):
    # xT_ref:        (F_pad, TB)        f32, batch on lanes
    # coefT_ref:     (O, D * F_pad)     f32, flattened coefficients (power-major, feature-minor)
    # intercept_ref: (O, 1)             f32
    # outT_ref:      (O, TB)            f32
    xT = xT_ref[...]
    f_pad = xT.shape[0]
    degree = coefT_ref.shape[1] // f_pad

    # Power expansion x^1 .. x^D, stacked along sublanes (each piece is f_pad rows,
    # f_pad is a multiple of 8 so the concat is tile-aligned).
    powers = [xT]
    xp = xT
    for _ in range(degree - 1):
        xp = xp * xT
        powers.append(xp)
    pw = jnp.concatenate(powers, axis=0)  # (D * F_pad, TB)

    # Single fused MXU contraction + intercept folded into the epilogue store.
    outT_ref[...] = (
        jnp.dot(coefT_ref[...], pw, preferred_element_type=jnp.float32)
        + intercept_ref[...]
    )


def _compute_coefficients(omega, alpha, tau, relationship_matrix=None,
                          directions=None, shared_directions=1):
    """Replicates the banded-matrix recursion of the PyTorch forward.
    Returns b with shape (degree, in_features, out_features)."""
    k = alpha.shape[0]
    sp_tau = jax.nn.softplus(tau)
    b = jax.nn.softplus(omega)  # (1, F, O)
    for i in range(k):
        c1 = -2.0 * alpha[i]
        c2 = alpha[i] ** 2 + sp_tau[i]
        # b_new[a] = (b[a] + b[a-1] * (-2*alpha) + b[a-2] * (alpha^2 + sp_tau)) / (i+1)
        b = (jnp.pad(b, ((0, 2), (0, 0), (0, 0)))
             + jnp.pad(b, ((1, 1), (0, 0), (0, 0))) * c1
             + jnp.pad(b, ((2, 0), (0, 0), (0, 0))) * c2) / (i + 1)
    if directions is not None:
        b = b * jnp.repeat(directions, shared_directions, axis=1)[None, :, :]
    if relationship_matrix is not None:
        b = jnp.where(relationship_matrix[None, :, :], b, 0.0)
    return b


def _choose_batch_tiling(batch, batch_tile):
    """Pick (tile, padded_batch, n_steps).

    * at least 2 grid steps whenever batch >= 256 so the "parallel" grid axis keeps
      both v7x TensorCores busy (single TC on v5e/v6e: harmless),
    * tile width <= batch_tile, multiple of 128,
    * batch pad waste bounded by one 128-lane tile per step (no rounding the whole
      batch up to a full batch_tile).
    """
    b128 = _round_up(max(batch, 1), 128)
    n_steps = max(-(-b128 // batch_tile), 2 if b128 >= 256 else 1)
    tb = _round_up(-(-b128 // n_steps), 128)
    return tb, n_steps * tb, n_steps


@functools.partial(
    jax.jit,
    static_argnames=("shared_directions", "batch_tile", "transpose_output"))
def monotone_polynomial_forward(x, omega, alpha, tau, intercept=None,
                                relationship_matrix=None,
                                directions=None, shared_directions=1,
                                batch_tile=2048, transpose_output=True):
    batch, in_features = x.shape
    out_features = omega.shape[2]

    # --- tiny coefficient recursion (JAX glue, fused into this jit) ----------------
    b = _compute_coefficients(omega, alpha, tau, relationship_matrix,
                              directions, shared_directions)  # (D, F, O)
    degree = b.shape[0]

    # Pad the feature dim to a sublane multiple so the in-kernel power concat is aligned.
    f_pad = _round_up(in_features, 8)
    b_pad = jnp.pad(b, ((0, 0), (0, f_pad - in_features), (0, 0)))
    # Flatten (D, F_pad, O) -> (D*F_pad, O) -> transpose to (O, D*F_pad).
    coefT = jnp.transpose(b_pad.reshape(degree * f_pad, out_features)).astype(jnp.float32)

    if intercept is None:
        intercept_col = jnp.zeros((out_features, 1), jnp.float32)
    else:
        intercept_col = intercept.reshape(out_features, 1).astype(jnp.float32)

    # --- batch on the lane axis, tiled over a 1-D grid -----------------------------
    tb, b_padded, n_steps = _choose_batch_tiling(batch, batch_tile)
    xT = jnp.pad(x.astype(jnp.float32).T,
                 ((0, f_pad - in_features), (0, b_padded - batch)))  # (F_pad, B_pad)

    # Advisory cost for XLA's scheduler around the custom call.
    flops = (2 * out_features * degree * f_pad * b_padded          # MXU contraction
             + (degree - 1) * f_pad * b_padded)                    # power chain
    bytes_accessed = 4 * ((f_pad + out_features) * b_padded
                          + out_features * degree * f_pad + out_features)

    # Deeper buffering on the streamed x tiles when the grid is long enough: per-step
    # compute is tiny, so steps are DMA-latency dominated.
    if n_steps >= 3:
        x_spec = pl.BlockSpec((f_pad, tb), lambda i: (0, i),
                              pipeline_mode=pl.Buffered(3))
    else:
        x_spec = pl.BlockSpec((f_pad, tb), lambda i: (0, i))

    outT = pl.pallas_call(
        _monotone_poly_kernel,
        out_shape=jax.ShapeDtypeStruct((out_features, b_padded), jnp.float32),
        grid_spec=pltpu.PrefetchScalarGridSpec(
            num_scalar_prefetch=0,
            grid=(n_steps,),
            in_specs=[
                x_spec,
                pl.BlockSpec((out_features, degree * f_pad), lambda i: (0, 0)),
                pl.BlockSpec((out_features, 1), lambda i: (0, 0)),
            ],
            out_specs=pl.BlockSpec((out_features, tb), lambda i: (0, i)),
        ),
        compiler_params=pltpu.CompilerParams(
            dimension_semantics=("parallel",),
        ),
        cost_estimate=pl.CostEstimate(flops=flops, transcendentals=0,
                                      bytes_accessed=bytes_accessed),
    )(xT, coefT, intercept_col)

    if transpose_output:
        # Module-faithful (batch, out_features). Done inside this jit so XLA fuses the
        # transpose/slice into the copy-out instead of a standalone lane-padded HBM pass.
        return outT.T[:batch]
    # Recommended for downstream fusion: lane-dense (out_features, batch) layout.
    return outT[:, :batch]


def _reference(x, omega, alpha, tau, intercept, relationship_matrix,
               directions, shared_directions):
    b_ref = _compute_coefficients(omega, alpha, tau, relationship_matrix,
                                  directions, shared_directions)
    degree = b_ref.shape[0]
    x_powers = x[:, :, None] ** jnp.arange(1, degree + 1, dtype=jnp.float32)
    out = jnp.einsum('abc,cbd->ad', x_powers, b_ref)
    if intercept is not None:
        out = out + intercept[None, :]
    return out


if __name__ == "__main__":
    # Module config: degree=7 (k=3), in_features=4, out_features=6, intercept=True,
    # negative_relationships=True with shared_directions=2, a relationship mask.
    degree = 7
    k = (degree - 1) // 2
    in_features, out_features, batch = 4, 6, 8
    shared_directions = 2

    key = jax.random.PRNGKey(0)
    k1, k2, k3, k4, k5, k6, k7 = jax.random.split(key, 7)
    omega = 0.1 * jax.random.normal(k1, (1, in_features, out_features), jnp.float32)
    alpha = 0.1 * jax.random.normal(k2, (k, in_features, out_features), jnp.float32)
    tau = -5.0 + 0.1 * jax.random.normal(k3, (k, in_features, out_features), jnp.float32)
    intercept = 0.1 * jax.random.normal(k4, (out_features,), jnp.float32)
    directions = jax.random.normal(
        k5, (in_features, out_features // shared_directions), jnp.float32)
    relationship_matrix = jnp.ones((in_features, out_features), dtype=bool).at[0, 0].set(False)
    x = jax.random.normal(k6, (batch, in_features), jnp.float32)

    out = monotone_polynomial_forward(
        x, omega, alpha, tau, intercept,
        relationship_matrix=relationship_matrix,
        directions=directions, shared_directions=shared_directions)
    out = jax.block_until_ready(out)
    ref = _reference(x, omega, alpha, tau, intercept,
                     relationship_matrix, directions, shared_directions)
    assert out.shape == (batch, out_features)
    assert jnp.allclose(out, ref, atol=1e-5, rtol=1e-5), (out, ref)

    # Second check: non-multiple-of-128 batch with a multi-step grid (tile = 128,
    # 3 steps -> exercises Buffered(3) on the x input and the partial-batch padding path).
    batch2 = 260
    x2 = jax.random.normal(k7, (batch2, in_features), jnp.float32)
    out2 = monotone_polynomial_forward(
        x2, omega, alpha, tau, intercept,
        relationship_matrix=relationship_matrix,
        directions=directions, shared_directions=shared_directions,
        batch_tile=128)
    out2 = jax.block_until_ready(out2)
    ref2 = _reference(x2, omega, alpha, tau, intercept,
                      relationship_matrix, directions, shared_directions)
    assert out2.shape == (batch2, out_features)
    assert jnp.allclose(out2, ref2, atol=1e-5, rtol=1e-5)

    # Lane-dense (O, B) output path (recommended layout for fused consumers).
    out2_t = monotone_polynomial_forward(
        x2, omega, alpha, tau, intercept,
        relationship_matrix=relationship_matrix,
        directions=directions, shared_directions=shared_directions,
        batch_tile=128, transpose_output=False)
    out2_t = jax.block_until_ready(out2_t)
    assert out2_t.shape == (out_features, batch2)
    assert jnp.allclose(out2_t, ref2.T, atol=1e-5, rtol=1e-5)

    print("KERNEL_OK")
</pallas_src>

<mosaic_0001>
module attributes {stable_mosaic.version = 11 : i64} {
  func.func @_monotone_poly_kernel(%arg0: i32, %arg1: memref<8x128xf32, #tpu.memory_space<vmem>>, %arg2: memref<6x56xf32, #tpu.memory_space<vmem>>, %arg3: memref<6x1xf32, #tpu.memory_space<vmem>>, %arg4: memref<6x128xf32, #tpu.memory_space<vmem>>) attributes {dimension_semantics = [#tpu.dimension_semantics<parallel>], iteration_bounds = array<i64: 1>, scalar_prefetch = 0 : i64, scratch_operands = 0 : i64, tpu.core_type = #tpu.core_type<tc>, window_params = [{transform_indices = @transform_0, window_bounds = array<i64: 8, 128>}, {pipeline_mode = #tpu.pipeline_mode<synchronous>, transform_indices = @transform_1, window_bounds = array<i64: 6, 56>}, {pipeline_mode = #tpu.pipeline_mode<synchronous>, transform_indices = @transform_2, window_bounds = array<i64: 6, 1>}, {transform_indices = @transform_3, window_bounds = array<i64: 6, 128>}]} {
    %c0 = arith.constant 0 : index
    %c0_0 = arith.constant 0 : index
    %0 = vector.load %arg1[%c0, %c0_0] : memref<8x128xf32, #tpu.memory_space<vmem>>, vector<8x128xf32>
    %1 = arith.mulf %0, %0 : vector<8x128xf32>
    %2 = arith.mulf %1, %0 : vector<8x128xf32>
    %3 = arith.mulf %2, %0 : vector<8x128xf32>
    %4 = arith.mulf %3, %0 : vector<8x128xf32>
    %5 = arith.mulf %4, %0 : vector<8x128xf32>
    %6 = arith.mulf %5, %0 : vector<8x128xf32>
    %7 = tpu.concatenate %0, %1, %2, %3, %4, %5, %6 in 0 : vector<8x128xf32>, vector<8x128xf32>, vector<8x128xf32>, vector<8x128xf32>, vector<8x128xf32>, vector<8x128xf32>, vector<8x128xf32> -> vector<56x128xf32>
    %c0_1 = arith.constant 0 : index
    %c0_2 = arith.constant 0 : index
    %8 = vector.load %arg2[%c0_1, %c0_2] : memref<6x56xf32, #tpu.memory_space<vmem>>, vector<6x56xf32>
    %cst = arith.constant dense<0.000000e+00> : vector<6x128xf32>
    %9 = tpu.matmul %8, %7, %cst {dimension_numbers = #tpu.dot_dimension_numbers<[1], [0], [0], [1], [0, 0, 1, 1], [], []>} : vector<6x56xf32>, vector<56x128xf32>, vector<6x128xf32> -> vector<6x128xf32>
    %c0_3 = arith.constant 0 : index
    %c0_4 = arith.constant 0 : index
    %10 = vector.load %arg3[%c0_3, %c0_4] : memref<6x1xf32, #tpu.memory_space<vmem>>, vector<6x1xf32>
    %11 = vector.broadcast %10 : vector<6x1xf32> to vector<6x128xf32>
    %12 = arith.addf %9, %11 : vector<6x128xf32>
    %c0_5 = arith.constant 0 : index
    %c0_6 = arith.constant 0 : index
    %13 = vector.load %arg4[%c0_5, %c0_6] : memref<6x128xf32, #tpu.memory_space<vmem>>, vector<6x128xf32>
    tpu.vector_store %arg4[%c0_5, %c0_6], %12 {strides = array<i32>} : memref<6x128xf32, #tpu.memory_space<vmem>>, vector<6x128xf32>,
    return
  }
  func.func @transform_0(%arg0: i32) -> (i32, i32) {
    %c0_i32 = arith.constant 0 : i32
    %c0_i32_0 = arith.constant 0 : i32
    return %c0_i32, %arg0 : i32, i32
  }
  func.func @transform_1(%arg0: i32) -> (i32, i32) {
    %c0_i32 = arith.constant 0 : i32
    %c0_i32_0 = arith.constant 0 : i32
    %c0_i32_1 = arith.constant 0 : i32
    return %c0_i32, %c0_i32_0 : i32, i32
  }
  func.func @transform_2(%arg0: i32) -> (i32, i32) {
    %c0_i32 = arith.constant 0 : i32
    %c0_i32_0 = arith.constant 0 : i32
    %c0_i32_1 = arith.constant 0 : i32
    return %c0_i32, %c0_i32_0 : i32, i32
  }
  func.func @transform_3(%arg0: i32) -> (i32, i32) {
    %c0_i32 = arith.constant 0 : i32
    %c0_i32_0 = arith.constant 0 : i32
    return %c0_i32, %arg0 : i32, i32
  }
}

</mosaic_0001>

<bundles_post_ra>
// kernel: monotone_polynomial_forward.1
= control target key start
LH: loop header
LB: loop body
LE: loop exit
PB: predicated region body
PF: predicated region fallthrough
CT: control target
= control target key end

     0   :  { %v147_v0 = vmov 0.0|0.0   ;;  %vm148_vm0 = vmmov 0   ;;  %v149_v2 = vmov 0.0   ;;  %v150_v5 = vmov 0   ;;  %s183_s0 = inlined_call_operand.vmem [shape: f32[8,128], index: 0, kind: input, shape index: {}]   ;;  %s184_s2 = inlined_call_operand.vmem [shape: f32[6,1], index: 2, kind: input, shape index: {}]   ;;  %s185_s1 = inlined_call_operand.vmem [shape: f32[6,56], index: 1, kind: input, shape index: {}]   ;;  %s186_s3 = inlined_call_operand.vmem [shape: f32[6,128], index: 3, kind: output, shape index: {}]  }
   0x1   :  { %133 = vmatprep.subr.bf16.mxu0 %v147_v0  ;;  %v14_v1 = vld [vmem:[%s183_s0] sm:$0xff]  ;;  %130 = vmatprep.mubr.msk.f32.mxu0 %vm148_vm0, %v149_v2  ;;  %vm28_vm1 = vcmask 457728  }
   0x2   :  { %v22_v3 = vld [vmem:[%s184_s2] sm:$0x3f]  ;;  %v15_v4 = vmul.f32 %v14_v1, %v14_v1  ;;  %146 = vset.pattern.permute.xlu0 %v150_v5 }
   0x3   :  { %25 = vperm.xlu0 %146, %v22_v3   ;;  %v21_v14 = vld [vmem:[%s185_s1] sm:$0x3f] }
   0x4   :  { %v16_v6 = vmul.f32 %v15_v4, %v14_v1  ;;  %v134_v7 = vpack.c.bf16 %v15_v4, %v14_v1 }
   0x6   :  { %135 = vmatpush3.bf16.msra.mxu0 %v134_v7  ;;  %v17_v8 = vmul.f32 %v16_v6, %v14_v1 }
   0x7   :  { %136 = vmatprep.subr.bf16.mxu0 %v147_v0 }
   0x8   :  { %v137_v9 = vpack.c.bf16 %v17_v8, %v16_v6  ;;  %v18_v10 = vmul.f32 %v17_v8, %v14_v1 }
   0xa   :  { %138 = vmatpush3.bf16.msra.mxu0 %v137_v9  ;;  %v19_v11 = vmul.f32 %v18_v10, %v14_v1 }
   0xb   :  { %139 = vmatprep.subr.bf16.mxu0 %v147_v0 }
   0xc   :  { %v140_v12 = vpack.c.bf16 %v19_v11, %v18_v10  ;;  %v20_v13 = vmul.f32 %v19_v11, %v14_v1 }
   0xe   :  { %141 = vmatpush3.bf16.msra.mxu0 %v140_v12 }
   0xf   :  { %128 = vmatprep.subr.mxu0 %v149_v2 }
  0x12   :  { %129 = vmatpush3.msra.mxu0 %v20_v13 }
  0x13   :  { %131 = vmatmul.mubr.msk.f32.vlgmr.msra.gmra.mrb[0].mxu0 %vm28_vm1, %v21_v14 }
  0x82   :  { %v26_v15 = vpop.permute.xlu0 %25 }
  0xe6   :  { %v98_v16 = vpop.f32.mrb[0].mxu0 }
  0xe7   :  { %v99_v17 = vadd.f32 %v98_v16, %v26_v15  ;;  %v132_v18 = vpop.f32.mrb[1].mxu0 }
  0xe9   :  { %102 = vst [vmem:[%s186_s3] sm:$0x3f] %v99_v17 }

</bundles_post_ra>
